<compile_context>
chip_gen: v6e
topology: v6e:2x2x1
jax: 0.10.0
libtpu: 0.0.40
codegen_flags: <defaults>
</compile_context>

<pallas_src>
import functools

import jax
import jax.numpy as jnp
from jax.experimental import pallas as pl
from jax.experimental.pallas import tpu as pltpu


def _round_up(x, m):
    return (x + m - 1) // m * m


def _vmem_capacity_bytes():
    """Physical per-core VMEM; conservative fallback = v7x (smallest, 64 MiB)."""
    try:
        return int(pltpu.get_tpu_info().vmem_capacity_bytes)
    except Exception:
        return 64 << 20


def _textcnn_kernel(x_ref, wslab_ref, bslab_ref, mask_ref, wfc_ref, bfc_ref,
                    logits_ref, sent_ref, *, S8):
    """One batch tile: fused conv (single lane-dense matmul over the pre-built
    im2row slab) + -inf mask + max-pool + bias + ReLU + FC."""
    x = x_ref[...]                                             # (TB, S8, KEpad) bf16
    TB, _, KE = x.shape

    # Single MXU matmul for ALL filter banks.  S8 is a multiple of 8 and KEpad
    # a multiple of 128, so the reshape just merges batch into sublanes.
    scores = jnp.dot(x.reshape(TB * S8, KE), wslab_ref[...],
                     preferred_element_type=jnp.float32)       # (TB*S8, NPAD) f32
    NPAD = scores.shape[-1]

    # Additive -inf mask (kept strictly in f32) kills invalid sliding-window
    # positions of the narrower banks and the padded sequence rows, then
    # max-pool over time.
    scores = scores.reshape(TB, S8, NPAD) + mask_ref[...][None]
    pooled = jnp.max(scores, axis=1)                           # (TB, NPAD) f32

    # Conv bias + ReLU after the pool (max is monotone, bias position-indep.).
    sent = jnp.maximum(pooled + bslab_ref[...], 0.0)           # (TB, NPAD) f32
    sent_ref[...] = sent.astype(sent_ref.dtype)                # bf16 writeback

    # Final Linear on the padded lane-dense slab (zero-padded FC rows/cols make
    # the padding contribute nothing).
    logits_ref[...] = (
        jnp.dot(sent.astype(jnp.bfloat16), wfc_ref[...],
                preferred_element_type=jnp.float32)
        + bfc_ref[...]
    )


def textcnn_forward(token_ids, params, kernel_sizes, *, tile_b=512):
    """Runs the TextCNN forward pass. Returns (logits[B,L], sent[B,1,NK*F])."""
    # Cast the embedding table to bf16 once and gather in bf16 (halves gathered
    # activation bytes vs. gather-f32-then-cast).
    emb_bf16 = params["embedding"].astype(jnp.bfloat16)        # (V, E)
    x = jnp.take(emb_bf16, token_ids, axis=0)                  # (B, S, E) bf16

    B, S, E = x.shape
    F_ = params["conv_w"][0].shape[-1]
    L = params["fc_w"].shape[-1]
    NK = len(kernel_sizes)
    K_max = max(kernel_sizes)

    KE = K_max * E
    KE_pad = _round_up(KE, 128)
    NPAD = _round_up(NK * F_, 128)
    LPAD = _round_up(L, 128)
    S8 = _round_up(S, 8)

    # ---- Batch-tile selection with real VMEM accounting -------------------
    bytes_per_batch_row = (
        2 * (S8 * KE_pad * 2)        # bf16 x tile, double-buffered
        + 2 * (NPAD * 2)             # bf16 sent out, double-buffered
        + 2 * (LPAD * 4)             # f32 logits out, double-buffered
        + S8 * NPAD * 4              # in-kernel f32 scores temporary
    )
    resident_bytes = 2 * (
        KE_pad * NPAD * 2            # conv weight slab (bf16)
        + S8 * NPAD * 4              # -inf mask (f32)
        + NPAD * LPAD * 2            # fc weight (bf16)
        + NPAD * 4 + LPAD * 4        # biases (f32)
    )
    vmem_total = _vmem_capacity_bytes()
    budget = int(vmem_total * 0.6)   # leave headroom for Mosaic internal scratch
    G = 16                           # sublane granularity (keeps bf16 tiles packed)
    tb_cap = max(G, (budget - resident_bytes) // bytes_per_batch_row // G * G)
    TB = max(G, min(tile_b, tb_cap, _round_up(B, G)) // G * G)
    # v7x has 2 TensorCores and "parallel" only shards grid axes: make sure the
    # grid has >= 2 steps whenever the batch allows it.
    if _round_up(B, TB) // TB < 2 and TB >= 2 * G:
        TB = max(G, _round_up(TB // 2, G))
    B_pad = _round_up(B, TB)

    per_step_bytes = resident_bytes + TB * bytes_per_batch_row
    vmem_limit = max(per_step_bytes * 3 // 2 + (4 << 20), 16 << 20)
    vmem_limit = int(min(vmem_limit, vmem_total - (8 << 20)))

    # ---- Wrapper-side im2row (layout plumbing, not compute) ---------------
    # Stack the K_max shifted windows of the trailing-zero-padded activation
    # along the feature axis -> (B, S, K_max*E), then pad to the lane-dense
    # kernel input (B_pad, S8, KE_pad).
    x_seq = jnp.pad(x, ((0, 0), (0, K_max - 1), (0, 0)))
    im2row = jnp.concatenate(
        [x_seq[:, dk:dk + S, :] for dk in range(K_max)], axis=-1)   # (B, S, KE)
    x_in = jnp.pad(im2row,
                   ((0, B_pad - B), (0, S8 - S), (0, KE_pad - KE)))

    # Fused conv weight slab (KE_pad, NPAD): bank i occupies rows [0 : k_i*E],
    # columns [i*F : (i+1)*F]; everything else zero.
    wslab = jnp.zeros((KE_pad, NPAD), jnp.float32)
    bslab = jnp.zeros((1, NPAD), jnp.float32)
    for i, k in enumerate(kernel_sizes):
        wk = params["conv_w"][i].astype(jnp.float32).reshape(k * E, F_)
        wslab = wslab.at[: k * E, i * F_:(i + 1) * F_].set(wk)
        bslab = bslab.at[:, i * F_:(i + 1) * F_].set(
            params["conv_b"][i].astype(jnp.float32))
    wslab = wslab.astype(jnp.bfloat16)

    # Additive mask (f32): bank i is only valid for t < S - k_i + 1 (this also
    # kills the padded sequence rows t >= S); padded NPAD columns stay 0.
    t_idx = jnp.arange(S8)[:, None]
    mask = jnp.zeros((S8, NPAD), jnp.float32)
    for i, k in enumerate(kernel_sizes):
        valid = (t_idx < (S - k + 1)).astype(jnp.float32)
        mask = mask.at[:, i * F_:(i + 1) * F_].set((valid - 1.0) * 1e30)

    # FC weight / bias padded to lane-dense (NPAD, LPAD) / (1, LPAD).
    wfc = jnp.zeros((NPAD, LPAD), jnp.float32)
    wfc = wfc.at[: NK * F_, :L].set(params["fc_w"].astype(jnp.float32))
    wfc = wfc.astype(jnp.bfloat16)
    bfc = jnp.zeros((1, LPAD), jnp.float32)
    bfc = bfc.at[:, :L].set(params["fc_b"].astype(jnp.float32))

    kernel = functools.partial(_textcnn_kernel, S8=S8)

    cost = pl.CostEstimate(
        flops=2 * B_pad * S8 * KE_pad * NPAD + 2 * B_pad * NPAD * LPAD,
        transcendentals=0,
        bytes_accessed=(x_in.size * 2 + wslab.size * 2 + mask.size * 4
                        + wfc.size * 2 + (NPAD + LPAD) * 4
                        + B_pad * LPAD * 4 + B_pad * NPAD * 2),
    )

    logits_pad, sent_pad = pl.pallas_call(
        kernel,
        out_shape=(
            jax.ShapeDtypeStruct((B_pad, LPAD), jnp.float32),
            jax.ShapeDtypeStruct((B_pad, NPAD), jnp.bfloat16),
        ),
        grid=(B_pad // TB,),
        in_specs=[
            pl.BlockSpec((TB, S8, KE_pad), lambda b: (b, 0, 0)),   # im2row slab
            pl.BlockSpec((KE_pad, NPAD), lambda b: (0, 0)),        # conv weights
            pl.BlockSpec((1, NPAD), lambda b: (0, 0)),             # conv bias
            pl.BlockSpec((S8, NPAD), lambda b: (0, 0)),            # -inf mask
            pl.BlockSpec((NPAD, LPAD), lambda b: (0, 0)),          # fc weight
            pl.BlockSpec((1, LPAD), lambda b: (0, 0)),             # fc bias
        ],
        out_specs=(
            pl.BlockSpec((TB, LPAD), lambda b: (b, 0)),
            pl.BlockSpec((TB, NPAD), lambda b: (b, 0)),
        ),
        compiler_params=pltpu.CompilerParams(
            dimension_semantics=("parallel",),
            vmem_limit_bytes=vmem_limit,
        ),
        cost_estimate=cost,
    )(x_in, wslab, bslab, mask, wfc, bfc)

    logits = logits_pad[:B, :L]
    sent = sent_pad[:B, : NK * F_].astype(jnp.float32)
    # PyTorch returns sent with the unsqueezed middle dim: (B, 1, NK*F)
    return logits, sent[:, None, :]


def _reference(token_ids, params, kernel_sizes):
    """Pure-JAX f32 reference mirroring the PyTorch forward."""
    x = jnp.take(params["embedding"], token_ids, axis=0).astype(jnp.float32)
    B, S, E = x.shape
    feats = []
    for i, k in enumerate(kernel_sizes):
        w = params["conv_w"][i]                                # (k, E, F)
        b = params["conv_b"][i]                                # (1, F)
        T = S - k + 1
        acc = jnp.zeros((B, T, w.shape[-1]), jnp.float32)
        for dk in range(k):
            acc = acc + jnp.einsum("bte,ef->btf", x[:, dk:dk + T, :], w[dk])
        acc = acc + b[None]
        feats.append(jnp.max(acc, axis=1))
    sent = jnp.maximum(jnp.concatenate(feats, axis=-1), 0.0)
    logits = sent @ params["fc_w"] + params["fc_b"]
    return logits, sent[:, None, :]


if __name__ == "__main__":
    # Small, deterministic synthetic config consistent with the module:
    # vocab=50, embedding_size=32, sequence_length=16, filter_count=8,
    # kernel_size=(2,3,4), labels=5, batch=2.
    V, E, S, B, F_, L = 50, 32, 16, 2, 8, 5
    kernel_sizes = (2, 3, 4)

    key = jax.random.PRNGKey(0)
    keys = jax.random.split(key, 10)

    embedding = jax.random.normal(keys[0], (V, E), jnp.float32)

    conv_w, conv_b = [], []
    for i, k in enumerate(kernel_sizes):
        # torch Conv2d weight is (F, 1, k, E); our layout is (k, E, F) == transposed.
        conv_w.append(0.1 * jax.random.normal(keys[1 + i], (k, E, F_), jnp.float32))
        conv_b.append(0.1 * jax.random.normal(keys[4 + i], (1, F_), jnp.float32))

    # torch Linear weight is (L, NK*F); we store its transpose (NK*F, L).
    fc_w = 0.1 * jax.random.normal(keys[7], (len(kernel_sizes) * F_, L), jnp.float32)
    fc_b = 0.1 * jax.random.normal(keys[8], (1, L), jnp.float32)

    tokens = jax.random.randint(keys[9], (B, S), 0, V, dtype=jnp.int32)

    params = dict(
        embedding=embedding, conv_w=conv_w, conv_b=conv_b, fc_w=fc_w, fc_b=fc_b
    )

    logits, sent = textcnn_forward(tokens, params, kernel_sizes)
    jax.block_until_ready((logits, sent))

    assert logits.shape == (B, L)
    assert sent.shape == (B, 1, len(kernel_sizes) * F_)

    # Numerical sanity check against the f32 reference (bf16 matmul tolerance).
    ref_logits, ref_sent = _reference(tokens, params, kernel_sizes)
    assert jnp.allclose(logits, ref_logits, atol=1e-1, rtol=1e-1)
    assert jnp.allclose(sent, ref_sent, atol=1e-1, rtol=1e-1)

    print("KERNEL_OK")
</pallas_src>

<mosaic_0001>
module attributes {stable_mosaic.version = 11 : i64} {
  func.func @_textcnn_kernel(%arg0: i32, %arg1: memref<16x16x128xbf16, #tpu.memory_space<vmem>>, %arg2: memref<128x128xbf16, #tpu.memory_space<vmem>>, %arg3: memref<1x128xf32, #tpu.memory_space<vmem>>, %arg4: memref<16x128xf32, #tpu.memory_space<vmem>>, %arg5: memref<128x128xbf16, #tpu.memory_space<vmem>>, %arg6: memref<1x128xf32, #tpu.memory_space<vmem>>, %arg7: memref<16x128xf32, #tpu.memory_space<vmem>>, %arg8: memref<16x128xbf16, #tpu.memory_space<vmem>>) attributes {dimension_semantics = [#tpu.dimension_semantics<parallel>], iteration_bounds = array<i64: 1>, scalar_prefetch = 0 : i64, scratch_operands = 0 : i64, tpu.core_type = #tpu.core_type<tc>, window_params = [{transform_indices = @transform_0, window_bounds = array<i64: 16, 16, 128>}, {pipeline_mode = #tpu.pipeline_mode<synchronous>, transform_indices = @transform_1, window_bounds = array<i64: 128, 128>}, {pipeline_mode = #tpu.pipeline_mode<synchronous>, transform_indices = @transform_2, window_bounds = array<i64: 1, 128>}, {pipeline_mode = #tpu.pipeline_mode<synchronous>, transform_indices = @transform_3, window_bounds = array<i64: 16, 128>}, {pipeline_mode = #tpu.pipeline_mode<synchronous>, transform_indices = @transform_4, window_bounds = array<i64: 128, 128>}, {pipeline_mode = #tpu.pipeline_mode<synchronous>, transform_indices = @transform_5, window_bounds = array<i64: 1, 128>}, {transform_indices = @transform_6, window_bounds = array<i64: 16, 128>}, {transform_indices = @transform_7, window_bounds = array<i64: 16, 128>}]} {
    %c0 = arith.constant 0 : index
    %c0_0 = arith.constant 0 : index
    %c0_1 = arith.constant 0 : index
    %0 = vector.load %arg1[%c0, %c0_0, %c0_1] : memref<16x16x128xbf16, #tpu.memory_space<vmem>>, vector<16x16x128xbf16>
    %1 = vector.shape_cast %0 : vector<16x16x128xbf16> to vector<256x128xbf16>
    %c0_2 = arith.constant 0 : index
    %c0_3 = arith.constant 0 : index
    %2 = vector.load %arg2[%c0_2, %c0_3] : memref<128x128xbf16, #tpu.memory_space<vmem>>, vector<128x128xbf16>
    %cst = arith.constant dense<0.000000e+00> : vector<256x128xf32>
    %3 = tpu.matmul %1, %2, %cst {dimension_numbers = #tpu.dot_dimension_numbers<[1], [0], [0], [1], [0, 0, 1, 1], [], []>} : vector<256x128xbf16>, vector<128x128xbf16>, vector<256x128xf32> -> vector<256x128xf32>
    %4 = vector.shape_cast %3 : vector<256x128xf32> to vector<16x16x128xf32>
    %c0_4 = arith.constant 0 : index
    %c0_5 = arith.constant 0 : index
    %5 = vector.load %arg4[%c0_4, %c0_5] : memref<16x128xf32, #tpu.memory_space<vmem>>, vector<16x128xf32>
    %6 = vector.shape_cast %5 : vector<16x128xf32> to vector<1x16x128xf32>
    %7 = vector.broadcast %6 : vector<1x16x128xf32> to vector<16x16x128xf32>
    %8 = arith.addf %4, %7 : vector<16x16x128xf32>
    %cst_6 = arith.constant dense<0xFF800000> : vector<16x128xf32>
    %9 = vector.multi_reduction <maximumf>, %8, %cst_6 [1] : vector<16x16x128xf32> to vector<16x128xf32>
    %c0_7 = arith.constant 0 : index
    %c0_8 = arith.constant 0 : index
    %10 = vector.load %arg3[%c0_7, %c0_8] : memref<1x128xf32, #tpu.memory_space<vmem>>, vector<1x128xf32>
    %11 = vector.broadcast %10 : vector<1x128xf32> to vector<16x128xf32>
    %12 = arith.addf %9, %11 : vector<16x128xf32>
    %cst_9 = arith.constant 0.000000e+00 : f32
    %13 = vector.broadcast %cst_9 : f32 to vector<16x128xf32>
    %14 = arith.maximumf %12, %13 : vector<16x128xf32>
    %15 = arith.truncf %14 : vector<16x128xf32> to vector<16x128xbf16>
    %c0_10 = arith.constant 0 : index
    %c0_11 = arith.constant 0 : index
    %16 = vector.load %arg8[%c0_10, %c0_11] : memref<16x128xbf16, #tpu.memory_space<vmem>>, vector<16x128xbf16>
    tpu.vector_store %arg8[%c0_10, %c0_11], %15 {strides = array<i32>} : memref<16x128xbf16, #tpu.memory_space<vmem>>, vector<16x128xbf16>,
    %17 = arith.truncf %14 : vector<16x128xf32> to vector<16x128xbf16>
    %c0_12 = arith.constant 0 : index
    %c0_13 = arith.constant 0 : index
    %18 = vector.load %arg5[%c0_12, %c0_13] : memref<128x128xbf16, #tpu.memory_space<vmem>>, vector<128x128xbf16>
    %cst_14 = arith.constant dense<0.000000e+00> : vector<16x128xf32>
    %19 = tpu.matmul %17, %18, %cst_14 {dimension_numbers = #tpu.dot_dimension_numbers<[1], [0], [0], [1], [0, 0, 1, 1], [], []>} : vector<16x128xbf16>, vector<128x128xbf16>, vector<16x128xf32> -> vector<16x128xf32>
    %c0_15 = arith.constant 0 : index
    %c0_16 = arith.constant 0 : index
    %20 = vector.load %arg6[%c0_15, %c0_16] : memref<1x128xf32, #tpu.memory_space<vmem>>, vector<1x128xf32>
    %21 = vector.broadcast %20 : vector<1x128xf32> to vector<16x128xf32>
    %22 = arith.addf %19, %21 : vector<16x128xf32>
    %c0_17 = arith.constant 0 : index
    %c0_18 = arith.constant 0 : index
    %23 = vector.load %arg7[%c0_17, %c0_18] : memref<16x128xf32, #tpu.memory_space<vmem>>, vector<16x128xf32>
    tpu.vector_store %arg7[%c0_17, %c0_18], %22 {strides = array<i32>} : memref<16x128xf32, #tpu.memory_space<vmem>>, vector<16x128xf32>,
    return
  }
  func.func @transform_0(%arg0: i32) -> (i32, i32, i32) {
    %c0_i32 = arith.constant 0 : i32
    %c0_i32_0 = arith.constant 0 : i32
    %c0_i32_1 = arith.constant 0 : i32
    return %arg0, %c0_i32, %c0_i32_0 : i32, i32, i32
  }
  func.func @transform_1(%arg0: i32) -> (i32, i32) {
    %c0_i32 = arith.constant 0 : i32
    %c0_i32_0 = arith.constant 0 : i32
    %c0_i32_1 = arith.constant 0 : i32
    return %c0_i32, %c0_i32_0 : i32, i32
  }
  func.func @transform_2(%arg0: i32) -> (i32, i32) {
    %c0_i32 = arith.constant 0 : i32
    %c0_i32_0 = arith.constant 0 : i32
    %c0_i32_1 = arith.constant 0 : i32
    return %c0_i32, %c0_i32_0 : i32, i32
  }
  func.func @transform_3(%arg0: i32) -> (i32, i32) {
    %c0_i32 = arith.constant 0 : i32
    %c0_i32_0 = arith.constant 0 : i32
    %c0_i32_1 = arith.constant 0 : i32
    return %c0_i32, %c0_i32_0 : i32, i32
  }
  func.func @transform_4(%arg0: i32) -> (i32, i32) {
    %c0_i32 = arith.constant 0 : i32
    %c0_i32_0 = arith.constant 0 : i32
    %c0_i32_1 = arith.constant 0 : i32
    return %c0_i32, %c0_i32_0 : i32, i32
  }
  func.func @transform_5(%arg0: i32) -> (i32, i32) {
    %c0_i32 = arith.constant 0 : i32
    %c0_i32_0 = arith.constant 0 : i32
    %c0_i32_1 = arith.constant 0 : i32
    return %c0_i32, %c0_i32_0 : i32, i32
  }
  func.func @transform_6(%arg0: i32) -> (i32, i32) {
    %c0_i32 = arith.constant 0 : i32
    %c0_i32_0 = arith.constant 0 : i32
    return %arg0, %c0_i32 : i32, i32
  }
  func.func @transform_7(%arg0: i32) -> (i32, i32) {
    %c0_i32 = arith.constant 0 : i32
    %c0_i32_0 = arith.constant 0 : i32
    return %arg0, %c0_i32 : i32, i32
  }
}

</mosaic_0001>

<bundles_post_ra>
// kernel: tpu_custom_call.1
= control target key start
LH: loop header
LB: loop body
LE: loop exit
PB: predicated region body
PF: predicated region fallthrough
CT: control target
= control target key end

     0   :  { %13 = vsyncpa [#allocation3], 0  ;;  %s1429_s0 = inlined_call_operand.hbm [shape: bf16[16,16,128], index: 0, kind: input, shape index: {}]   ;;  %s1430_s1 = inlined_call_operand.hbm [shape: bf16[128,128], index: 1, kind: input, shape index: {}]   ;;  %s1431_s2 = inlined_call_operand.vmem [shape: f32[1,128], index: 2, kind: input, shape index: {}]   ;;  %s1432_s3 = inlined_call_operand.hbm [shape: f32[16,128], index: 3, kind: input, shape index: {}]   ;;  %s1433_s4 = inlined_call_operand.hbm [shape: bf16[128,128], index: 4, kind: input, shape index: {}]   ;;  %s1434_s5 = inlined_call_operand.vmem [shape: f32[1,128], index: 5, kind: input, shape index: {}]   ;;  %s1435_s6 = inlined_call_operand.hbm [shape: f32[16,128], index: 6, kind: output, shape index: {0}]   ;;  %s1436_s7 = inlined_call_operand.hbm [shape: bf16[16,128], index: 7, kind: output, shape index: {1}]  }
   0x1   :  { %14 = vsyncpa [#allocation6], 0 }
   0x2   :  { %15 = vsyncpa [#allocation9], 0 }
   0x3   :  { %16 = vsyncpa [#allocation4], 0 }
   0x4   :  { %17 = vsyncpa [#allocation12], 0  ;;  %s1262_s24 = smov [#allocation5]   ;;  %s1263_s26 = smov [#allocation2]  }
   0x5   :  { %s35_s25 = sshll.u32 %s1262_s24, 4  ;;  %s23_s27 = sshll.u32 %s1263_s26, 4  ;;  %s36_s25 = int_to_ptr.vmem [resolvable:$true] %s35_s25  ;;  %s24_s27 = int_to_ptr.vmem [resolvable:$true] %s23_s27 }
   0x6   :  { %s1140_s28 = scalar_lea.vmem %s36_s25, 1024  ;;  %p1145_p1 = scmp.lt.s32.totalorder %s36_s25, %s36_s25 }
   0x7   :  { %p1141_p0 = scmp.ne.s32.totalorder %s36_s25, %s1140_s28  ;;  %p1146_p2 = scmp.lt.s32.totalorder %s1140_s28, %s1140_s28 }
   0x9   :  { %p1147_p3 = por %p1146_p2, %p1145_p1 }
   0xb   :  { %p1148_p4 = pnand %p1147_p3, %p1141_p0 }
   0xd   :  { %1151 = shalt.err (!%p1148_p4)
}
   0xe   :  { %s1264_s29 = smov 64   ;;  %s1265_s30 = smov 4  }
   0xf   :  { %41 = dma.hbm_to_vmem [thread:$0]  %s1430_s1, 1024, %s36_s25, [#allocation6], %s1264_s29, %s1264_s29, %s1265_s30  }
  0x10   :  { %s1160_s10 = scalar_lea.vmem %s24_s27, 2048  ;;  %p1165_p6 = scmp.lt.s32.totalorder %s24_s27, %s24_s27 }
  0x11   :  { %p1161_p5 = scmp.ne.s32.totalorder %s24_s27, %s1160_s10  ;;  %p1166_p7 = scmp.lt.s32.totalorder %s1160_s10, %s1160_s10 }
  0x13   :  { %p1167_p8 = por %p1166_p7, %p1165_p6 }
  0x15   :  { %p1168_p9 = pnand %p1167_p8, %p1161_p5 }
  0x17   :  { %1171 = shalt.err (!%p1168_p9)
}
  0x18   :  { %29 = dma.hbm_to_vmem [thread:$0]  %s1429_s0, 2048, %s24_s27, [#allocation3], %s1264_s29, %s1264_s29, %s1265_s30  }
  0x19   :  { %s1266_s13 = smov [#allocation7]  }
  0x1a   :  { %s49_s14 = sshll.u32 %s1266_s13, 4  ;;  %s50_s14 = int_to_ptr.vmem [resolvable:$true] %s49_s14 }
  0x1b   :  { %s1180_s15 = scalar_lea.vmem %s50_s14, 256  ;;  %p1185_p11 = scmp.lt.s32.totalorder %s50_s14, %s50_s14 }
  0x1c   :  { %p1181_p10 = scmp.ne.s32.totalorder %s50_s14, %s1180_s15  ;;  %p1186_p12 = scmp.lt.s32.totalorder %s1180_s15, %s1180_s15 }
  0x1e   :  { %p1187_p13 = por %p1186_p12, %p1185_p11 }
  0x20   :  { %p1188_p0 = pnand %p1187_p13, %p1181_p10 }
  0x22   :  { %1191 = shalt.err (!%p1188_p0)
}
  0x23   :  { %s1267_s1 = smov 128   ;;  %s1268_s16 = smov 8  }
  0x24   :  { %55 = dma.hbm_to_vmem [thread:$0]  %s1432_s3, 256, %s50_s14, [#allocation6], %s1267_s1, %s1267_s1, %s1268_s16  }
  0x25   :  { %s1269_s0 = smov [#allocation8]  }
  0x26   :  { %s61_s19 = sshll.u32 %s1269_s0, 4  ;;  %s62_s19 = int_to_ptr.vmem [resolvable:$true] %s61_s19 }
  0x27   :  { %s1200_s20 = scalar_lea.vmem %s62_s19, 1024  ;;  %p1205_p2 = scmp.lt.s32.totalorder %s62_s19, %s62_s19 }
  0x28   :  { %p1201_p1 = scmp.ne.s32.totalorder %s62_s19, %s1200_s20  ;;  %p1206_p3 = scmp.lt.s32.totalorder %s1200_s20, %s1200_s20 }
  0x2a   :  { %p1207_p4 = por %p1206_p3, %p1205_p2 }
  0x2c   :  { %p1208_p5 = pnand %p1207_p4, %p1201_p1 }
  0x2e   :  { %1211 = shalt.err (!%p1208_p5)
}
  0x2f   :  { %67 = dma.hbm_to_vmem [thread:$0]  %s1433_s4, 1024, %s62_s19, [#allocation9], %s1264_s29, %s1264_s29, %s1265_s30  }
  0x30   :  { %1252 = dma.done.wait [#allocation3], 2048  }
  0x31   :  { %1253 = vsyncadd [#allocation3], 4294965248 }
  0x32   :  { %1254 = dma.done.wait [#allocation6], 1280  }
  0x33   :  { %1255 = vsyncadd [#allocation6], 4294966016 }
  0x34   :  { %1256 = dma.done.wait [#allocation9], 1024  }
  0x35   :  { %1257 = vsyncadd [#allocation9], 4294966272  ;;  %v1100_v0 = vld [vmem:[#allocation5 + $0x38] sm:$0xff]   ;;  %v1101_v1 = vld [vmem:[#allocation5 + $0x30] sm:$0xff]   ;;  %v1270_v25 = vmov 0.0   ;;  %vm1271_vm0 = vmmov 0  }
  0x36   :  { %1020 = vmatprep.subr.bf16.mxu0 %v1100_v0  ;;  %v1102_v2 = vld [vmem:[#allocation5 + $0x28] sm:$0xff]   ;;  %v1103_v3 = vld [vmem:[#allocation5 + $0x20] sm:$0xff]   ;;  %v1104_v5 = vld [vmem:[#allocation5 + $0x18] sm:$0xff]   ;;  %1068 = vmatprep.subr.bf16.mxu1 %v1270_v25  ;;  %vm702_vm1 = vcmask 1041409   ;;  %vm705_vm2 = vcmask 1042434   ;;  %vm708_vm3 = vcmask 1043459  }
  0x37   :  { %1021 = vmatpush3.bf16.msra.mxu0 %v1100_v0  ;;  %v1108_v4 = vld [vmem:[#allocation2] sm:$0xff]   ;;  %v1105_v6 = vld [vmem:[#allocation5 + $0x10] sm:$0xff]   ;;  %v1106_v7 = vld [vmem:[#allocation5 + $0x8] sm:$0xff]   ;;  %1084 = vmatprep.mubr.msk.bf16.mxu1 %vm1271_vm0, %v1270_v25  ;;  %vm711_vm4 = vcmask 1044484   ;;  %vm714_vm5 = vcmask 1045509   ;;  %vm717_vm6 = vcmask 1046534  }
  0x38   :  { %1022 = vmatprep.subr.bf16.mxu0 %v1101_v1  ;;  %1036 = vmatprep.mubr.bf16.mxu0 %v1108_v4  ;;  %v1107_v8 = vld [vmem:[#allocation5] sm:$0xff]   ;;  %v1109_v9 = vld [vmem:[#allocation2 + $0x8] sm:$0xff]   ;;  %v1110_v10 = vld [vmem:[#allocation2 + $0x10] sm:$0xff]   ;;  %vm720_vm7 = vcmask 1047559  }
  0x39   :  { %v1111_v11 = vld [vmem:[#allocation2 + $0x18] sm:$0xff]   ;;  %v1112_v12 = vld [vmem:[#allocation2 + $0x20] sm:$0xff]   ;;  %v1113_v13 = vld [vmem:[#allocation2 + $0x28] sm:$0xff]  }
  0x3a   :  { %v1114_v14 = vld [vmem:[#allocation2 + $0x30] sm:$0xff]   ;;  %v1115_v15 = vld [vmem:[#allocation2 + $0x38] sm:$0xff]   ;;  %v1116_v16 = vld [vmem:[#allocation2 + $0x40] sm:$0xff]  }
  0x3b   :  { %1023 = vmatpush3.bf16.msra.mxu0 %v1101_v1  ;;  %v1117_v17 = vld [vmem:[#allocation2 + $0x48] sm:$0xff]   ;;  %v1118_v18 = vld [vmem:[#allocation2 + $0x50] sm:$0xff]   ;;  %v1119_v19 = vld [vmem:[#allocation2 + $0x58] sm:$0xff]  }
  0x3c   :  { %1024 = vmatprep.subr.bf16.mxu0 %v1102_v2  ;;  %v1120_v20 = vld [vmem:[#allocation2 + $0x60] sm:$0xff]   ;;  %v1121_v21 = vld [vmem:[#allocation2 + $0x68] sm:$0xff]   ;;  %v1122_v22 = vld [vmem:[#allocation2 + $0x70] sm:$0xff]  }
  0x3d   :  { %v1123_v23 = vld [vmem:[#allocation2 + $0x78] sm:$0xff]   ;;  %v1124_v24 = vld [vmem:[#allocation8 + $0x38] sm:$0xff]   ;;  %v1125_v26 = vld [vmem:[#allocation8 + $0x30] sm:$0xff]  }
  0x3e   :  { %1069 = vmatpush3.bf16.msra.mxu1 %v1124_v24  ;;  %v1126_v27 = vld [vmem:[#allocation8 + $0x28] sm:$0xff]   ;;  %v1127_v28 = vld [vmem:[#allocation8 + $0x20] sm:$0xff]   ;;  %v1128_v29 = vld [vmem:[#allocation8 + $0x18] sm:$0xff]  }
  0x3f   :  { %1025 = vmatpush3.bf16.msra.mxu0 %v1102_v2  ;;  %1070 = vmatprep.subr.bf16.mxu1 %v1270_v25  ;;  %v1129_v30 = vld [vmem:[#allocation8 + $0x10] sm:$0xff]   ;;  %v1130_v31 = vld [vmem:[#allocation8 + $0x8] sm:$0xff]   ;;  %v1131_v32 = vld [vmem:[#allocation8] sm:$0xff]  }
  0x40   :  { %1026 = vmatprep.subr.bf16.mxu0 %v1103_v3  ;;  %v1338_v34 = vld [vmem:[#allocation7] sm:$0xff]  ;;  %v1340_v36 = vld [vmem:[#allocation7 + $0x8] sm:$0xff] }
  0x42   :  { %1071 = vmatpush3.bf16.msra.mxu1 %v1125_v26 }
  0x43   :  { %1027 = vmatpush3.bf16.msra.mxu0 %v1103_v3  ;;  %1072 = vmatprep.subr.bf16.mxu1 %v1270_v25 }
  0x44   :  { %1028 = vmatprep.subr.bf16.mxu0 %v1104_v5 }
  0x46   :  { %1073 = vmatpush3.bf16.msra.mxu1 %v1126_v27 }
  0x47   :  { %1029 = vmatpush3.bf16.msra.mxu0 %v1104_v5  ;;  %1074 = vmatprep.subr.bf16.mxu1 %v1270_v25 }
  0x48   :  { %1030 = vmatprep.subr.bf16.mxu0 %v1105_v6 }
  0x4a   :  { %1075 = vmatpush3.bf16.msra.mxu1 %v1127_v28 }
  0x4b   :  { %1031 = vmatpush3.bf16.msra.mxu0 %v1105_v6  ;;  %1076 = vmatprep.subr.bf16.mxu1 %v1270_v25  ;;  %v1353_v6 = vld [vmem:[%s1431_s2] ss:$0 sm:$0xff]  ;;  %s1272_s2 = smov [#allocation11]  }
  0x4c   :  { %1032 = vmatprep.subr.bf16.mxu0 %v1106_v7  ;;  %s903_s23 = sshll.u32 %s1272_s2, 4  ;;  %s904_s23 = int_to_ptr.vmem [resolvable:$true] %s903_s23 }
  0x4d   :  { %s1212_s24 = scalar_lea.vmem %s904_s23, 128  ;;  %p1217_p7 = scmp.lt.s32.totalorder %s904_s23, %s904_s23 }
  0x4e   :  { %1077 = vmatpush3.bf16.msra.mxu1 %v1128_v29  ;;  %p1213_p6 = scmp.ne.s32.totalorder %s904_s23, %s1212_s24  ;;  %p1218_p8 = scmp.lt.s32.totalorder %s1212_s24, %s1212_s24 }
  0x4f   :  { %1033 = vmatpush3.bf16.msra.mxu0 %v1106_v7  ;;  %1078 = vmatprep.subr.bf16.mxu1 %v1270_v25 }
  0x50   :  { %1034 = vmatprep.subr.bf16.mxu0 %v1107_v8  ;;  %p1219_p9 = por %p1218_p8, %p1217_p7 }
  0x52   :  { %1079 = vmatpush3.bf16.msra.mxu1 %v1129_v30  ;;  %p1220_p10 = pnand %p1219_p9, %p1213_p6 }
  0x53   :  { %1035 = vmatpush3.bf16.msra.mxu0 %v1107_v8  ;;  %1080 = vmatprep.subr.bf16.mxu1 %v1270_v25 }
  0x56   :  { %1037 = vmatmul.mubr.bf16.vlgmr.msra.gmra.mxu0 %v1109_v9  ;;  %1081 = vmatpush3.bf16.msra.mxu1 %v1130_v31 }
  0x57   :  { %1040 = vmatprep.mubr.bf16.mxu0 %v1110_v10  ;;  %1082 = vmatprep.subr.bf16.mxu1 %v1270_v25 }
  0x5a   :  { %1083 = vmatpush3.bf16.msra.mxu1 %v1131_v32 }
  0x5e   :  { %1041 = vmatmul.mubr.bf16.gmra.mxu0 %v1111_v11 }
  0x5f   :  { %1044 = vmatprep.mubr.bf16.mxu0 %v1112_v12 }
  0x66   :  { %1045 = vmatmul.mubr.bf16.gmra.mxu0 %v1113_v13 }
  0x67   :  { %1048 = vmatprep.mubr.bf16.mxu0 %v1114_v14 }
  0x6e   :  { %1049 = vmatmul.mubr.bf16.gmra.mxu0 %v1115_v15 }
  0x6f   :  { %1052 = vmatprep.mubr.bf16.mxu0 %v1116_v16 }
  0x76   :  { %1053 = vmatmul.mubr.bf16.gmra.mxu0 %v1117_v17 }
  0x77   :  { %1056 = vmatprep.mubr.bf16.mxu0 %v1118_v18 }
  0x7e   :  { %1057 = vmatmul.mubr.bf16.gmra.mxu0 %v1119_v19 }
  0x7f   :  { %1060 = vmatprep.mubr.bf16.mxu0 %v1120_v20 }
  0x86   :  { %1061 = vmatmul.mubr.bf16.gmra.mxu0 %v1121_v21 }
  0x87   :  { %1064 = vmatprep.mubr.bf16.mxu0 %v1122_v22 }
  0x8e   :  { %1065 = vmatmul.mubr.bf16.gmra.mxu0 %v1123_v23 }
 0x116   :  { %v1038_v33 = vpop.f32.mrf.mxu0 }
 0x117   :  { %v440_v38 = vadd.f32 %v1038_v33, %v1338_v34 }
 0x118   :  { %v309_v35 = vpop.f32.mrf.mxu0 }
 0x119   :  { %v438_v41 = vadd.f32 %v1338_v34, %v309_v35 }
 0x11a   :  { %v1039_v37 = vpop.f32.mrf.mxu0 }
 0x11b   :  { %v441_v39 = vadd.f32 %v1039_v37, %v1340_v36 }
 0x11c   :  { %v312_v40 = vpop.f32.mrf.mxu0 }
 0x11d   :  { %v477_v42 = vmax.f32 %v440_v38, %v441_v39  ;;  %v439_v43 = vadd.f32 %v1340_v36, %v312_v40 }
 0x11e   :  { %v1042_v44 = vpop.f32.mrf.mxu0 }
 0x11f   :  { %v478_v45 = vrot.slane %v477_v42, 4  ;;  %v470_v46 = vmax.f32 %v438_v41, %v439_v43  ;;  %v444_v53 = vadd.f32 %v1042_v44, %v1338_v34 }
 0x120   :  { %v325_v47 = vpop.f32.mrf.mxu0 }
 0x121   :  { %v479_v48 = vmax.f32 %v477_v42, %v478_v45  ;;  %v471_v49 = vrot.slane %v470_v46, 4  ;;  %v442_v55 = vadd.f32 %v1338_v34, %v325_v47 }
 0x122   :  { %v1043_v50 = vpop.f32.mrf.mxu0 }
 0x123   :  { %v480_v51 = vrot.slane %v479_v48, 2  ;;  %v472_v52 = vmax.f32 %v470_v46, %v471_v49  ;;  %v445_v54 = vadd.f32 %v1043_v50, %v1340_v36 }
 0x124   :  { %v328_v56 = vpop.f32.mrf.mxu0 }
 0x125   :  { %v481_v57 = vmax.f32 %v479_v48, %v480_v51  ;;  %v473_v58 = vrot.slane %v472_v52, 2  ;;  %v491_v59 = vmax.f32 %v444_v53, %v445_v54  ;;  %v443_v60 = vadd.f32 %v1340_v36, %v328_v56 }
 0x126   :  { %v1046_v61 = vpop.f32.mrf.mxu0 }
 0x127   :  { %v482_v62 = vrot.slane %v481_v57, 1  ;;  %v474_v63 = vmax.f32 %v472_v52, %v473_v58  ;;  %v492_v0 = vrot.slane %v491_v59, 4  ;;  %v484_v1 = vmax.f32 %v442_v55, %v443_v60 }
 0x128   :  { %v341_v2 = vpop.f32.mrf.mxu0  ;;  %v448_v11 = vadd.f32 %v1046_v61, %v1338_v34 }
 0x129   :  { %v483_v3 = vmax.f32 %v481_v57, %v482_v62  ;;  %v493_v4 = vmax.f32 %v491_v59, %v492_v0  ;;  %v485_v5 = vrot.slane %v484_v1, 4  ;;  %v475_v7 = vrot.slane %v474_v63, 1 }
 0x12a   :  { %v1047_v8 = vpop.f32.mrf.mxu0  ;;  %v446_v18 = vadd.f32 %v1338_v34, %v341_v2 }
 0x12b   :  { %v494_v9 = vrot.slane %v493_v4, 2  ;;  %v486_v10 = vmax.f32 %v484_v1, %v485_v5  ;;  %v449_v12 = vadd.f32 %v1047_v8, %v1340_v36  ;;  %v590_v14 = vadd.f32 %v1353_v6, %v483_v3 }
 0x12c   :  { %v344_v13 = vpop.f32.mrf.mxu0  ;;  %v476_v17 = vmax.f32 %v474_v63, %v475_v7 }
 0x12d   :  { %v495_v15 = vmax.f32 %v493_v4, %v494_v9  ;;  %v487_v16 = vrot.slane %v486_v10, 2  ;;  %v505_v19 = vmax.f32 %v448_v11, %v449_v12  ;;  %v447_v20 = vadd.f32 %v1340_v36, %v344_v13 }
 0x12e   :  { %v1050_v21 = vpop.f32.mrf.mxu0  ;;  %v606_v27 = vmax.f32 %v590_v14, 0.0  ;;  %v589_v29 = vadd.f32 %v1353_v6, %v476_v17 }
 0x12f   :  { %v496_v22 = vrot.slane %v495_v15, 1  ;;  %v488_v23 = vmax.f32 %v486_v10, %v487_v16  ;;  %v506_v24 = vrot.slane %v505_v19, 4  ;;  %v498_v25 = vmax.f32 %v446_v18, %v447_v20 }
 0x130   :  { %v357_v26 = vpop.f32.mrf.mxu0  ;;  %v452_v39 = vadd.f32 %v1050_v21, %v1338_v34  ;;  %v622_v42 = vpack.c.bf16 %v606_v27, %v606_v27  ;;  %v605_v46 = vmax.f32 %v589_v29, 0.0 }
 0x131   :  { %v489_v28 = vrot.slane %v488_v23, 1  ;;  %v507_v30 = vmax.f32 %v505_v19, %v506_v24  ;;  %v499_v31 = vrot.slane %v498_v25, 4  ;;  %v497_v33 = vmax.f32 %v495_v15, %v496_v22 }
 0x132   :  { %v1051_v32 = vpop.f32.mrf.mxu0  ;;  %v450_v44 = vadd.f32 %v1338_v34, %v357_v26  ;;  %v654_v58 = vunpack.c.l.b16 %v622_v42  ;;  %v621_v61 = vpack.c.bf16 %v605_v46, %v605_v46 }
 0x133   :  { %v490_v35 = vmax.f32 %v488_v23, %v489_v28  ;;  %v508_v37 = vrot.slane %v507_v30, 2  ;;  %v500_v38 = vmax.f32 %v498_v25, %v499_v31  ;;  %v453_v40 = vadd.f32 %v1051_v32, %v1340_v36 }
 0x134   :  { %v360_v41 = vpop.f32.mrf.mxu0  ;;  %v592_v51 = vadd.f32 %v1353_v6, %v497_v33  ;;  %v701_v20 = vrot.slane %v654_v58, 7  ;;  %v653_v24 = vunpack.c.l.b16 %v621_v61 }
 0x135   :  { %v591_v43 = vadd.f32 %v1353_v6, %v490_v35  ;;  %v451_v45 = vadd.f32 %v1340_v36, %v360_v41  ;;  %v509_v47 = vmax.f32 %v507_v30, %v508_v37  ;;  %v501_v48 = vrot.slane %v500_v38, 2 }
 0x136   :  { %v519_v49 = vmax.f32 %v452_v39, %v453_v40  ;;  %v1054_v50 = vpop.f32.mrf.mxu0  ;;  %v608_v2 = vmax.f32 %v592_v51, 0.0 }
 0x137   :  { %v607_v52 = vmax.f32 %v591_v43, 0.0  ;;  %v512_v53 = vmax.f32 %v450_v44, %v451_v45  ;;  %v510_v54 = vrot.slane %v509_v47, 1  ;;  %v502_v55 = vmax.f32 %v500_v38, %v501_v48 }
 0x138   :  { %v520_v56 = vrot.slane %v519_v49, 4  ;;  %v373_v57 = vpop.f32.mrf.mxu0  ;;  %v456_v4 = vadd.f32 %v1054_v50, %v1338_v34  ;;  %v624_v25 = vpack.c.bf16 %v608_v2, %v608_v2  ;;  %v703_v48 = vsel %vm702_vm1, %v701_v20, %v653_v24 }
 0x139   :  { %v623_v59 = vpack.c.bf16 %v607_v52, %v607_v52  ;;  %v513_v60 = vrot.slane %v512_v53, 4  ;;  %v511_v62 = vmax.f32 %v509_v47, %v510_v54  ;;  %v503_v63 = vrot.slane %v502_v55, 1 }
 0x13a   :  { %v521_v0 = vmax.f32 %v519_v49, %v520_v56  ;;  %v1055_v1 = vpop.f32.mrf.mxu0  ;;  %v454_v10 = vadd.f32 %v1338_v34, %v373_v57  ;;  %v656_v44 = vunpack.c.l.b16 %v624_v25 }
 0x13b   :  { %v514_v3 = vmax.f32 %v512_v53, %v513_v60  ;;  %v457_v5 = vadd.f32 %v1055_v1, %v1340_v36  ;;  %v594_v7 = vadd.f32 %v1353_v6, %v511_v62  ;;  %v504_v8 = vmax.f32 %v502_v55, %v503_v63 }
 0x13c   :  { %v522_v9 = vrot.slane %v521_v0, 2  ;;  %v376_v11 = vpop.f32.mrf.mxu0  ;;  %v655_v12 = vunpack.c.l.b16 %v623_v59  ;;  %v707_v61 = vrot.slane %v656_v44, 5 }
 0x13d   :  { %v515_v13 = vrot.slane %v514_v3, 2  ;;  %v533_v14 = vmax.f32 %v456_v4, %v457_v5  ;;  %v455_v15 = vadd.f32 %v1340_v36, %v376_v11  ;;  %v610_v16 = vmax.f32 %v594_v7, 0.0 }
 0x13e   :  { %v593_v17 = vadd.f32 %v1353_v6, %v504_v8  ;;  %v523_v18 = vmax.f32 %v521_v0, %v522_v9  ;;  %v1058_v19 = vpop.f32.mrf.mxu0  ;;  %v704_v29 = vrot.slane %v655_v12, 6 }
 0x13f   :  { %v516_v21 = vmax.f32 %v514_v3, %v515_v13  ;;  %v534_v22 = vrot.slane %v533_v14, 4  ;;  %v526_v23 = vmax.f32 %v454_v10, %v455_v15  ;;  %v626_v33 = vpack.c.bf16 %v610_v16, %v610_v16 }
 0x140   :  { %v609_v26 = vmax.f32 %v593_v17, 0.0  ;;  %v524_v27 = vrot.slane %v523_v18, 1  ;;  %v389_v28 = vpop.f32.mrf.mxu0  ;;  %v460_v38 = vadd.f32 %v1058_v19, %v1338_v34  ;;  %v706_v60 = vsel %vm705_vm2, %v704_v29, %v703_v48 }
 0x141   :  { %v517_v30 = vrot.slane %v516_v21, 1  ;;  %v535_v31 = vmax.f32 %v533_v14, %v534_v22  ;;  %v527_v32 = vrot.slane %v526_v23, 4  ;;  %v458_v53 = vadd.f32 %v1338_v34, %v389_v28 }
 0x142   :  { %v625_v35 = vpack.c.bf16 %v609_v26, %v609_v26  ;;  %v525_v37 = vmax.f32 %v523_v18, %v524_v27  ;;  %v1059_v39 = vpop.f32.mrf.mxu0  ;;  %v658_v57 = vunpack.c.l.b16 %v626_v33  ;;  %v709_v9 = vsel %vm708_vm3, %v707_v61, %v706_v60 }
 0x143   :  { %v518_v40 = vmax.f32 %v516_v21, %v517_v30  ;;  %v536_v41 = vrot.slane %v535_v31, 2  ;;  %v528_v42 = vmax.f32 %v526_v23, %v527_v32  ;;  %v461_v43 = vadd.f32 %v1059_v39, %v1340_v36 }
 0x144   :  { %v657_v45 = vunpack.c.l.b16 %v625_v35  ;;  %v596_v46 = vadd.f32 %v1353_v6, %v525_v37  ;;  %v392_v47 = vpop.f32.mrf.mxu0  ;;  %v713_v10 = vrot.slane %v658_v57, 3 }
 0x145   :  { %v595_v49 = vadd.f32 %v1353_v6, %v518_v40  ;;  %v537_v50 = vmax.f32 %v535_v31, %v536_v41  ;;  %v547_v51 = vmax.f32 %v460_v38, %v461_v43  ;;  %v529_v52 = vrot.slane %v528_v42, 2 }
 0x146   :  { %v459_v54 = vadd.f32 %v1340_v36, %v392_v47  ;;  %v1062_v55 = vpop.f32.mrf.mxu0  ;;  %v612_v56 = vmax.f32 %v596_v46, 0.0  ;;  %v710_v62 = vrot.slane %v657_v45, 4 }
 0x147   :  { %v611_v58 = vmax.f32 %v595_v49, 0.0  ;;  %v548_v59 = vrot.slane %v547_v51, 4  ;;  %v538_v3 = vrot.slane %v537_v50, 1  ;;  %v530_v5 = vmax.f32 %v528_v42, %v529_v52 }
 0x148   :  { %v540_v63 = vmax.f32 %v458_v53, %v459_v54  ;;  %v405_v0 = vpop.f32.mrf.mxu0  ;;  %v628_v1 = vpack.c.bf16 %v612_v56, %v612_v56  ;;  %v464_v13 = vadd.f32 %v1062_v55, %v1338_v34  ;;  %v712_v18 = vsel %vm711_vm4, %v710_v62, %v709_v9 }
 0x149   :  { %v627_v2 = vpack.c.bf16 %v611_v58, %v611_v58  ;;  %v549_v4 = vmax.f32 %v547_v51, %v548_v59  ;;  %v539_v19 = vmax.f32 %v537_v50, %v538_v3  ;;  %v462_v21 = vadd.f32 %v1338_v34, %v405_v0 }
 0x14a   :  { %v541_v7 = vrot.slane %v540_v63, 4  ;;  %v1063_v8 = vpop.f32.mrf.mxu0  ;;  %v660_v17 = vunpack.c.l.b16 %v628_v1  ;;  %v531_v23 = vrot.slane %v530_v5, 1  ;;  %v715_v30 = vsel %vm714_vm5, %v713_v10, %v712_v18 }
 0x14b   :  { %v659_v11 = vunpack.c.l.b16 %v627_v2  ;;  %v550_v12 = vrot.slane %v549_v4, 2  ;;  %v465_v15 = vadd.f32 %v1063_v8, %v1340_v36  ;;  %v598_v38 = vadd.f32 %v1353_v6, %v539_v19 }
 0x14c   :  { %v542_v14 = vmax.f32 %v540_v63, %v541_v7  ;;  %v408_v16 = vpop.f32.mrf.mxu0  ;;  %v719_v37 = vrot.slane %v660_v17, 1  ;;  %v532_v40 = vmax.f32 %v530_v5, %v531_v23 }
 0x14d   :  { %v551_v20 = vmax.f32 %v549_v4, %v550_v12  ;;  %v463_v22 = vadd.f32 %v1340_v36, %v408_v16  ;;  %v561_v25 = vmax.f32 %v464_v13, %v465_v15  ;;  %v716_v27 = vrot.slane %v659_v11, 2 }
 0x14e   :  { %v543_v24 = vrot.slane %v542_v14, 2  ;;  %v1066_v26 = vpop.f32.mrf.mxu0  ;;  %v614_v53 = vmax.f32 %v598_v38, 0.0  ;;  %v597_v57 = vadd.f32 %v1353_v6, %v532_v40 }
 0x14f   :  { %v552_v28 = vrot.slane %v551_v20, 1  ;;  %v554_v29 = vmax.f32 %v462_v21, %v463_v22  ;;  %v562_v32 = vrot.slane %v561_v25, 4  ;;  %v718_v35 = vsel %vm717_vm6, %v716_v27, %v715_v30 }
 0x150   :  { %v544_v31 = vmax.f32 %v542_v14, %v543_v24  ;;  %v421_v33 = vpop.f32.mrf.mxu0  ;;  %v1391_v44 = vsel %vm720_vm7, %v719_v37, %v718_v35  ;;  %v468_v47 = vadd.f32 %v1066_v26, %v1338_v34  ;;  %v630_v5 = vpack.c.bf16 %v614_v53, %v614_v53 }
 0x151   :  { %v555_v39 = vrot.slane %v554_v29, 4  ;;  %v563_v42 = vmax.f32 %v561_v25, %v562_v32  ;;  %v553_v45 = vmax.f32 %v551_v20, %v552_v28  ;;  %v736_v52 = vpack.c.b16 %v1391_v44, %v1391_v44 }
 0x152   :  { %v545_v41 = vrot.slane %v544_v31, 1  ;;  %v1067_v43 = vpop.f32.mrf.mxu0  ;;  %v466_v55 = vadd.f32 %v1338_v34, %v421_v33  ;;  %v613_v34 = vmax.f32 %v597_v57, 0.0  ;;  %v662_v16 = vunpack.c.l.b16 %v630_v5 }
 0x153   :  { %v556_v46 = vmax.f32 %v554_v29, %v555_v39  ;;  %v564_v49 = vrot.slane %v563_v42, 2  ;;  %v469_v50 = vadd.f32 %v1067_v43, %v1340_v36  ;;  %740 = vst [vmem:[#allocation11] sm:$0xf] %v736_v52  ;;  %v600_v63 = vadd.f32 %v1353_v6, %v553_v45 }
 0x154   :  { %v546_v48 = vmax.f32 %v544_v31, %v545_v41  ;;  %v424_v51 = vpop.f32.mrf.mxu0  ;;  %v629_v17 = vpack.c.bf16 %v613_v34, %v613_v34  ;;  %v722_v27 = vrot.slane %v662_v16, 7 }
 0x155   :  { %v557_v54 = vrot.slane %v556_v46, 2  ;;  %v467_v56 = vadd.f32 %v1340_v36, %v424_v51  ;;  %v565_v59 = vmax.f32 %v563_v42, %v564_v49  ;;  %v575_v60 = vmax.f32 %v468_v47, %v469_v50 }
 0x156   :  { %v599_v58 = vadd.f32 %v1353_v6, %v546_v48  ;;  %v616_v11 = vmax.f32 %v600_v63, 0.0  ;;  %v661_v28 = vunpack.c.l.b16 %v629_v17 }
 0x157   :  { %v558_v61 = vmax.f32 %v556_v46, %v557_v54  ;;  %v568_v62 = vmax.f32 %v466_v55, %v467_v56  ;;  %v566_v1 = vrot.slane %v565_v59, 1  ;;  %v576_v2 = vrot.slane %v575_v60, 4 }
 0x158   :  { %v615_v0 = vmax.f32 %v599_v58, 0.0  ;;  %v632_v22 = vpack.c.bf16 %v616_v11, %v616_v11  ;;  %v723_v39 = vsel %vm702_vm1, %v722_v27, %v661_v28 }
 0x159   :  { %v559_v3 = vrot.slane %v558_v61, 1  ;;  %v569_v4 = vrot.slane %v568_v62, 4  ;;  %v567_v7 = vmax.f32 %v565_v59, %v566_v1  ;;  %v577_v36 = vmax.f32 %v575_v60, %v576_v2 }
 0x15a   :  { %v631_v8 = vpack.c.bf16 %v615_v0, %v615_v0  ;;  %v664_v33 = vunpack.c.l.b16 %v632_v22 }
 0x15b   :  { %v560_v9 = vmax.f32 %v558_v61, %v559_v3  ;;  %v570_v10 = vmax.f32 %v568_v62, %v569_v4  ;;  %v602_v12 = vadd.f32 %v1353_v6, %v567_v7  ;;  %v578_v13 = vrot.slane %v577_v36, 2 }
 0x15c   :  { %v663_v19 = vunpack.c.l.b16 %v631_v8  ;;  %v726_v45 = vrot.slane %v664_v33, 5 }
 0x15d   :  { %v601_v14 = vadd.f32 %v1353_v6, %v560_v9  ;;  %v571_v15 = vrot.slane %v570_v10, 2  ;;  %v579_v18 = vmax.f32 %v577_v36, %v578_v13  ;;  %v618_v23 = vmax.f32 %v602_v12, 0.0 }
 0x15e   :  { %v724_v30 = vrot.slane %v663_v19, 6 }
 0x15f   :  { %v617_v20 = vmax.f32 %v601_v14, 0.0  ;;  %v572_v21 = vmax.f32 %v570_v10, %v571_v15  ;;  %v580_v24 = vrot.slane %v579_v18, 1  ;;  %v634_v35 = vpack.c.bf16 %v618_v23, %v618_v23 }
 0x160   :  { %v725_v43 = vsel %vm705_vm2, %v724_v30, %v723_v39 }
 0x161   :  { %v633_v25 = vpack.c.bf16 %v617_v20, %v617_v20  ;;  %v573_v26 = vrot.slane %v572_v21, 1  ;;  %v581_v29 = vmax.f32 %v579_v18, %v580_v24  ;;  %v666_v46 = vunpack.c.l.b16 %v634_v35 }
 0x162   :  { %v727_v50 = vsel %vm708_vm3, %v726_v45, %v725_v43 }
 0x163   :  { %v665_v31 = vunpack.c.l.b16 %v633_v25  ;;  %v574_v32 = vmax.f32 %v572_v21, %v573_v26  ;;  %v604_v37 = vadd.f32 %v1353_v6, %v581_v29  ;;  %v730_v53 = vrot.slane %v666_v46, 3 }
 0x165   :  { %v603_v38 = vadd.f32 %v1353_v6, %v574_v32  ;;  %v620_v40 = vmax.f32 %v604_v37, 0.0  ;;  %v728_v41 = vrot.slane %v665_v31, 4 }
 0x167   :  { %v619_v42 = vmax.f32 %v603_v38, 0.0  ;;  %v636_v47 = vpack.c.bf16 %v620_v40, %v620_v40  ;;  %v729_v52 = vsel %vm711_vm4, %v728_v41, %v727_v50 }
 0x168   :  { %v731_v6 = vsel %vm714_vm5, %v730_v53, %v729_v52 }
 0x169   :  { %v635_v48 = vpack.c.bf16 %v619_v42, %v619_v42  ;;  %v668_v49 = vunpack.c.l.b16 %v636_v47 }
 0x16b   :  { %v667_v51 = vunpack.c.l.b16 %v635_v48  ;;  %v734_v55 = vrot.slane %v668_v49, 1 }
 0x16d   :  { %v732_v54 = vrot.slane %v667_v51, 2 }
 0x16f   :  { %v733_v56 = vsel %vm717_vm6, %v732_v54, %v731_v6 }
 0x170   :  { %v735_v57 = vsel %vm720_vm7, %v734_v55, %v733_v56 }
 0x171   :  { %v793_v58 = vpack.c.b16 %v735_v57, %v1391_v44  ;;  %v737_v59 = vpack.c.b16 %v735_v57, %v735_v57 }
 0x173   :  { %1085 = vmatmul.mubr.bf16.vlgmr.msra.gmra.mxu1 %v793_v58  ;;  %741 = vst [vmem:[#allocation11 + $0x4] sm:$0xf] %v737_v59 }
 0x174   :  { %1223 = shalt.err (!%p1220_p10)
}
 0x175   :  { %909 = dma.vmem_to_hbm [thread:$0]  %s904_s23, 128, %s1436_s7, [#allocation12], %s1264_s29, %s1264_s29, %s1265_s30  }
 0x176   :  { %v962_v44 = vld [vmem:[%s1434_s5] ss:$0 sm:$0xff]  ;;  %s1273_s8 = smov [#allocation10]  }
 0x177   :  { %s891_s9 = sshll.u32 %s1273_s8, 4  ;;  %s892_s9 = int_to_ptr.vmem [resolvable:$true] %s891_s9 }
 0x178   :  { %s1232_s10 = scalar_lea.vmem %s892_s9, 256  ;;  %p1237_p12 = scmp.lt.s32.totalorder %s892_s9, %s892_s9 }
 0x179   :  { %p1233_p11 = scmp.ne.s32.totalorder %s892_s9, %s1232_s10  ;;  %p1238_p13 = scmp.lt.s32.totalorder %s1232_s10, %s1232_s10 }
 0x17b   :  { %p1239_p0 = por %p1238_p13, %p1237_p12 }
 0x17d   :  { %p1240_p1 = pnand %p1239_p0, %p1233_p11 }
 0x233   :  { %v877_v60 = vpop.f32.mrf.mxu1 }
 0x234   :  { %v878_v61 = vadd.f32 %v962_v44, %v877_v60 }
 0x235   :  { %v1086_v62 = vpop.f32.mrf.mxu1 }
 0x236   :  { %884 = vst [vmem:[#allocation10] sm:$0xff] %v878_v61 }
 0x237   :  { %v880_v63 = vpop.f32.mrf.mxu1 }
 0x238   :  { %v881_v0 = vadd.f32 %v962_v44, %v880_v63 }
 0x239   :  { %v1087_v1 = vpop.f32.mrf.mxu1 }
 0x23a   :  { %885 = vst [vmem:[#allocation10 + $0x8] sm:$0xff] %v881_v0 }
 0x23b   :  { %1243 = shalt.err (!%p1240_p1)
}
 0x23c   :  { %897 = dma.vmem_to_hbm [thread:$0]  %s892_s9, 256, %s1435_s6, [#allocation4], %s1267_s1, %s1267_s1, %s1268_s16  }
 0x23d   :  { %1258 = dma.done.wait [#allocation4], 256  }
 0x23e   :  { %1259 = vsyncadd [#allocation4], 4294967040 }
 0x23f   :  { %1260 = dma.done.wait [#allocation12], 128  }
 0x240   :  { %1261 = vsyncadd [#allocation12], 4294967168 }
 0x241   :  { %916 = vsyncpa [#allocation3], 1 }
 0x242   :  { %917 = vsyncpa [#allocation6], 1 }
 0x243   :  { %918 = vsyncpa [#allocation9], 1 }
 0x244   :  { %919 = vsyncpa [#allocation4], 1 }
 0x245   :  { %920 = vsyncpa [#allocation12], 1 }

</bundles_post_ra>
